<compile_context>
chip_gen: v7x
topology: tpu7x:2x2x1
jax: 0.10.0
libtpu: 0.0.40
codegen_flags: <defaults>
</compile_context>

<pallas_src>
import jax
import jax.numpy as jnp
from jax.experimental import pallas as pl
from jax.experimental.pallas import tpu as pltpu

_CHUNK = 512        # rows per in-kernel compute sub-chunk (multiple of 8)
_MAX_TILE = 16384   # hard cap on rows per grid step


def _round_up(n, m):
    return ((n + m - 1) // m) * m


def _vmem_limit_bytes():
    """~3/4 of this generation's physical VMEM, capped at 100 MiB."""
    cap = 64 * 1024 * 1024            # v7x-safe fallback
    try:
        info = pltpu.get_tpu_info()
        cap = int(getattr(info, "vmem_capacity_bytes", cap) or cap)
    except Exception:
        pass
    return min((cap * 3) // 4, 100 * 1024 * 1024)


def _choose_tile(b_pad, vmem_limit):
    """Rows per grid step, derived from the VMEM budget."""
    # Per row of the block: x (9 -> 128 lanes) 512 B + out 512 B, each
    # double-buffered -> 2 KiB/row.  Reserve ~6 MiB for chunk temporaries,
    # resident weights and Mosaic internal scratch.
    budget = max(vmem_limit - 6 * 1024 * 1024, 2 * 1024 * 1024)
    cap = max(_CHUNK, min(_MAX_TILE, (budget // 2048) // _CHUNK * _CHUNK))
    if b_pad <= _CHUNK:
        return b_pad                           # single small block
    # Keep >= ~8 grid steps when the batch allows it so the "parallel" batch
    # axis can feed both TensorCores on v7x (megacore sharding).
    target = _round_up(-(-b_pad // 8), _CHUNK)
    return max(_CHUNK, min(cap, target))


def _make_kernel(chunk_rows, n_chunks):
    """Kernel factory: chunk_rows/n_chunks are static Python ints."""

    def _chunk(row0, x_ref, w1, b1, w2, b2, w3, b3, out_ref):
        x = x_ref[pl.ds(row0, chunk_rows), :]                              # (c, 9)
        h = jnp.dot(x, w1, preferred_element_type=jnp.float32) + b1
        h = jnp.maximum(h, 0.0)                                            # (c, 8)
        h = jnp.dot(h, w2, preferred_element_type=jnp.float32) + b2
        h = jnp.maximum(h, 0.0)                                            # (c, 6)
        logits = jnp.dot(h, w3, preferred_element_type=jnp.float32) + b3   # (c, 3)
        # Numerically stable softmax over the 3 classes.
        m = jnp.max(logits, axis=-1, keepdims=True)
        e = jnp.exp(logits - m)
        s = jnp.sum(e, axis=-1, keepdims=True)
        probs = e * pl.reciprocal(s, approx=False)
        out_ref[pl.ds(row0, chunk_rows), :] = probs.astype(out_ref.dtype)

    def kernel(x_ref, w1_ref, b1_ref, w2_ref, b2_ref, w3_ref, b3_ref, out_ref):
        w1, b1 = w1_ref[...], b1_ref[...]
        w2, b2 = w2_ref[...], b2_ref[...]
        w3, b3 = w3_ref[...], b3_ref[...]
        if n_chunks == 1:
            _chunk(0, x_ref, w1, b1, w2, b2, w3, b3, out_ref)
        else:
            # Non-unrolled loop bounds live ranges to one chunk of padded
            # intermediates; loop overhead is negligible vs. the 512-row body
            # and the whole kernel is hidden under the input DMA anyway.
            def body(c, carry):
                row0 = pl.multiple_of(c * chunk_rows, chunk_rows)
                _chunk(row0, x_ref, w1, b1, w2, b2, w3, b3, out_ref)
                return carry
            jax.lax.fori_loop(0, n_chunks, body, 0)

    return kernel


def actor_forward(x, params):
    """x: (B, 9) f32 -> softmax policy (B, 3) f32."""
    w1, b1, w2, b2, w3, b3 = params
    if x.dtype != jnp.float32:
        # Perf note: non-f32 callers pay one extra cast pass here.
        x = x.astype(jnp.float32)
    B = x.shape[0]

    # Pad batch to a multiple of 8 (f32 sublane) so block shapes are legal.
    b_pad = _round_up(max(B, 8), 8)
    if b_pad != B:
        x = jnp.pad(x, ((0, b_pad - B), (0, 0)))

    vmem_limit = _vmem_limit_bytes()
    tile_b = _choose_tile(b_pad, vmem_limit)
    chunk_rows = min(_CHUNK, tile_b)
    n_chunks = tile_b // chunk_rows            # exact by construction
    grid = (pl.cdiv(b_pad, tile_b),)

    # Pre-transpose to (in, out) so the kernel computes y = x @ W + b,
    # matching torch's y = x @ W.T + b.
    w1t, w2t, w3t = w1.T, w2.T, w3.T
    b1r, b2r, b3r = b1.reshape(1, -1), b2.reshape(1, -1), b3.reshape(1, -1)

    def resident(shape):
        # Constant index_map: parameters fetched once, VMEM-resident across steps.
        return pl.BlockSpec(shape, lambda i: (0, 0))

    out = pl.pallas_call(
        _make_kernel(chunk_rows, n_chunks),
        out_shape=jax.ShapeDtypeStruct((b_pad, 3), jnp.float32),
        grid=grid,
        in_specs=[
            pl.BlockSpec((tile_b, 9), lambda i: (i, 0)),
            resident((9, 8)), resident((1, 8)),
            resident((8, 6)), resident((1, 6)),
            resident((6, 3)), resident((1, 3)),
        ],
        out_specs=pl.BlockSpec((tile_b, 3), lambda i: (i, 0)),
        compiler_params=pltpu.CompilerParams(
            dimension_semantics=("parallel",),
            vmem_limit_bytes=int(vmem_limit)),
    )(x, w1t, b1r, w2t, b2r, w3t, b3r)

    return out[:B] if b_pad != B else out


def init_params(key):
    """Deterministic init matching nn.Linear shapes (out_features, in_features)."""
    k1, k2, k3, k4, k5, k6 = jax.random.split(key, 6)

    def uniform(k, shape, fan_in):
        bound = 1.0 / jnp.sqrt(fan_in)
        return jax.random.uniform(k, shape, jnp.float32, -bound, bound)

    w1 = uniform(k1, (8, 9), 9.0)
    b1 = uniform(k2, (8,), 9.0)
    w2 = uniform(k3, (6, 8), 8.0)
    b2 = uniform(k4, (6,), 8.0)
    w3 = uniform(k5, (3, 6), 6.0)
    b3 = uniform(k6, (3,), 6.0)
    return (w1, b1, w2, b2, w3, b3)


def reference_forward(x, params):
    """Plain-JAX reference replicating the PyTorch forward exactly."""
    w1, b1, w2, b2, w3, b3 = params
    h = jnp.maximum(x @ w1.T + b1, 0.0)
    h = jnp.maximum(h @ w2.T + b2, 0.0)
    logits = h @ w3.T + b3
    return jax.nn.softmax(logits, axis=-1)


if __name__ == "__main__":
    key = jax.random.PRNGKey(0)
    kp, kx1, kx2 = jax.random.split(key, 3)
    params = init_params(kp)

    # Small demo batch consistent with the tiny MLP.
    B = 64
    x = jax.random.normal(kx1, (B, 9), jnp.float32)
    out = jax.block_until_ready(actor_forward(x, params))
    ref = reference_forward(x, params)
    assert out.shape == (B, 3)
    assert jnp.allclose(out, ref, atol=1e-5, rtol=1e-5)
    assert jnp.allclose(jnp.sum(out, axis=-1), 1.0, atol=1e-5)

    # Larger batch: exercises the multi-step grid, the in-kernel chunk loop,
    # a partial last block, and batch padding (B not a multiple of 8).
    B2 = 4100
    x2 = jax.random.normal(kx2, (B2, 9), jnp.float32)
    out2 = jax.block_until_ready(actor_forward(x2, params))
    ref2 = reference_forward(x2, params)
    assert out2.shape == (B2, 3)
    assert jnp.allclose(out2, ref2, atol=1e-5, rtol=1e-5)
    assert jnp.allclose(jnp.sum(out2, axis=-1), 1.0, atol=1e-5)

    print("KERNEL_OK")
</pallas_src>

<mosaic_0001>
module attributes {stable_mosaic.version = 11 : i64} {
  func.func @kernel(%arg0: i32, %arg1: memref<64x9xf32, #tpu.memory_space<vmem>>, %arg2: memref<9x8xf32, #tpu.memory_space<vmem>>, %arg3: memref<1x8xf32, #tpu.memory_space<vmem>>, %arg4: memref<8x6xf32, #tpu.memory_space<vmem>>, %arg5: memref<1x6xf32, #tpu.memory_space<vmem>>, %arg6: memref<6x3xf32, #tpu.memory_space<vmem>>, %arg7: memref<1x3xf32, #tpu.memory_space<vmem>>, %arg8: memref<64x3xf32, #tpu.memory_space<vmem>>) attributes {dimension_semantics = [#tpu.dimension_semantics<parallel>], iteration_bounds = array<i64: 1>, scalar_prefetch = 0 : i64, scratch_operands = 0 : i64, tpu.core_type = #tpu.core_type<tc>, window_params = [{transform_indices = @transform_0, window_bounds = array<i64: 64, 9>}, {pipeline_mode = #tpu.pipeline_mode<synchronous>, transform_indices = @transform_1, window_bounds = array<i64: 9, 8>}, {pipeline_mode = #tpu.pipeline_mode<synchronous>, transform_indices = @transform_2, window_bounds = array<i64: 1, 8>}, {pipeline_mode = #tpu.pipeline_mode<synchronous>, transform_indices = @transform_3, window_bounds = array<i64: 8, 6>}, {pipeline_mode = #tpu.pipeline_mode<synchronous>, transform_indices = @transform_4, window_bounds = array<i64: 1, 6>}, {pipeline_mode = #tpu.pipeline_mode<synchronous>, transform_indices = @transform_5, window_bounds = array<i64: 6, 3>}, {pipeline_mode = #tpu.pipeline_mode<synchronous>, transform_indices = @transform_6, window_bounds = array<i64: 1, 3>}, {transform_indices = @transform_7, window_bounds = array<i64: 64, 3>}]} {
    %c0 = arith.constant 0 : index
    %c0_0 = arith.constant 0 : index
    %0 = vector.load %arg2[%c0, %c0_0] : memref<9x8xf32, #tpu.memory_space<vmem>>, vector<9x8xf32>
    %c0_1 = arith.constant 0 : index
    %c0_2 = arith.constant 0 : index
    %1 = vector.load %arg3[%c0_1, %c0_2] : memref<1x8xf32, #tpu.memory_space<vmem>>, vector<1x8xf32>
    %c0_3 = arith.constant 0 : index
    %c0_4 = arith.constant 0 : index
    %2 = vector.load %arg4[%c0_3, %c0_4] : memref<8x6xf32, #tpu.memory_space<vmem>>, vector<8x6xf32>
    %c0_5 = arith.constant 0 : index
    %c0_6 = arith.constant 0 : index
    %3 = vector.load %arg5[%c0_5, %c0_6] : memref<1x6xf32, #tpu.memory_space<vmem>>, vector<1x6xf32>
    %c0_7 = arith.constant 0 : index
    %c0_8 = arith.constant 0 : index
    %4 = vector.load %arg6[%c0_7, %c0_8] : memref<6x3xf32, #tpu.memory_space<vmem>>, vector<6x3xf32>
    %c0_9 = arith.constant 0 : index
    %c0_10 = arith.constant 0 : index
    %5 = vector.load %arg7[%c0_9, %c0_10] : memref<1x3xf32, #tpu.memory_space<vmem>>, vector<1x3xf32>
    %c0_11 = arith.constant 0 : index
    %c0_12 = arith.constant 0 : index
    %6 = vector.load %arg1[%c0_11, %c0_12] : memref<64x9xf32, #tpu.memory_space<vmem>>, vector<64x9xf32>
    %cst = arith.constant dense<0.000000e+00> : vector<64x8xf32>
    %7 = tpu.matmul %6, %0, %cst {dimension_numbers = #tpu.dot_dimension_numbers<[1], [0], [0], [1], [0, 0, 1, 1], [], []>} : vector<64x9xf32>, vector<9x8xf32>, vector<64x8xf32> -> vector<64x8xf32>
    %8 = vector.broadcast %1 : vector<1x8xf32> to vector<64x8xf32>
    %9 = arith.addf %7, %8 : vector<64x8xf32>
    %cst_13 = arith.constant 0.000000e+00 : f32
    %10 = vector.broadcast %cst_13 : f32 to vector<64x8xf32>
    %11 = arith.maximumf %9, %10 : vector<64x8xf32>
    %cst_14 = arith.constant dense<0.000000e+00> : vector<64x6xf32>
    %12 = tpu.matmul %11, %2, %cst_14 {dimension_numbers = #tpu.dot_dimension_numbers<[1], [0], [0], [1], [0, 0, 1, 1], [], []>} : vector<64x8xf32>, vector<8x6xf32>, vector<64x6xf32> -> vector<64x6xf32>
    %13 = vector.broadcast %3 : vector<1x6xf32> to vector<64x6xf32>
    %14 = arith.addf %12, %13 : vector<64x6xf32>
    %cst_15 = arith.constant 0.000000e+00 : f32
    %15 = vector.broadcast %cst_15 : f32 to vector<64x6xf32>
    %16 = arith.maximumf %14, %15 : vector<64x6xf32>
    %cst_16 = arith.constant dense<0.000000e+00> : vector<64x3xf32>
    %17 = tpu.matmul %16, %4, %cst_16 {dimension_numbers = #tpu.dot_dimension_numbers<[1], [0], [0], [1], [0, 0, 1, 1], [], []>} : vector<64x6xf32>, vector<6x3xf32>, vector<64x3xf32> -> vector<64x3xf32>
    %18 = vector.broadcast %5 : vector<1x3xf32> to vector<64x3xf32>
    %19 = arith.addf %17, %18 : vector<64x3xf32>
    %cst_17 = arith.constant dense<0xFF800000> : vector<64xf32>
    %20 = vector.multi_reduction <maximumf>, %19, %cst_17 [1] : vector<64x3xf32> to vector<64xf32>
    %21 = vector.shape_cast %20 : vector<64xf32> to vector<64x1xf32>
    %22 = vector.broadcast %21 : vector<64x1xf32> to vector<64x3xf32>
    %23 = arith.subf %19, %22 : vector<64x3xf32>
    %24 = math.exp %23 : vector<64x3xf32>
    %cst_18 = arith.constant dense<0.000000e+00> : vector<64xf32>
    %25 = vector.multi_reduction <add>, %24, %cst_18 [1] : vector<64x3xf32> to vector<64xf32>
    %26 = vector.shape_cast %25 : vector<64xf32> to vector<64x1xf32>
    %27 = tpu.reciprocal %26 : vector<64x1xf32> -> vector<64x1xf32>
    %28 = vector.broadcast %27 : vector<64x1xf32> to vector<64x3xf32>
    %29 = arith.mulf %24, %28 : vector<64x3xf32>
    %c0_19 = arith.constant 0 : index
    %c0_20 = arith.constant 0 : index
    %30 = vector.load %arg8[%c0_19, %c0_20] : memref<64x3xf32, #tpu.memory_space<vmem>>, vector<64x3xf32>
    tpu.vector_store %arg8[%c0_19, %c0_20], %29 {strides = array<i32>} : memref<64x3xf32, #tpu.memory_space<vmem>>, vector<64x3xf32>,
    return
  }
  func.func @transform_0(%arg0: i32) -> (i32, i32) {
    %c0_i32 = arith.constant 0 : i32
    %c0_i32_0 = arith.constant 0 : i32
    return %arg0, %c0_i32 : i32, i32
  }
  func.func @transform_1(%arg0: i32) -> (i32, i32) {
    %c0_i32 = arith.constant 0 : i32
    %c0_i32_0 = arith.constant 0 : i32
    %c0_i32_1 = arith.constant 0 : i32
    return %c0_i32, %c0_i32_0 : i32, i32
  }
  func.func @transform_2(%arg0: i32) -> (i32, i32) {
    %c0_i32 = arith.constant 0 : i32
    %c0_i32_0 = arith.constant 0 : i32
    %c0_i32_1 = arith.constant 0 : i32
    return %c0_i32, %c0_i32_0 : i32, i32
  }
  func.func @transform_3(%arg0: i32) -> (i32, i32) {
    %c0_i32 = arith.constant 0 : i32
    %c0_i32_0 = arith.constant 0 : i32
    %c0_i32_1 = arith.constant 0 : i32
    return %c0_i32, %c0_i32_0 : i32, i32
  }
  func.func @transform_4(%arg0: i32) -> (i32, i32) {
    %c0_i32 = arith.constant 0 : i32
    %c0_i32_0 = arith.constant 0 : i32
    %c0_i32_1 = arith.constant 0 : i32
    return %c0_i32, %c0_i32_0 : i32, i32
  }
  func.func @transform_5(%arg0: i32) -> (i32, i32) {
    %c0_i32 = arith.constant 0 : i32
    %c0_i32_0 = arith.constant 0 : i32
    %c0_i32_1 = arith.constant 0 : i32
    return %c0_i32, %c0_i32_0 : i32, i32
  }
  func.func @transform_6(%arg0: i32) -> (i32, i32) {
    %c0_i32 = arith.constant 0 : i32
    %c0_i32_0 = arith.constant 0 : i32
    %c0_i32_1 = arith.constant 0 : i32
    return %c0_i32, %c0_i32_0 : i32, i32
  }
  func.func @transform_7(%arg0: i32) -> (i32, i32) {
    %c0_i32 = arith.constant 0 : i32
    %c0_i32_0 = arith.constant 0 : i32
    return %arg0, %c0_i32 : i32, i32
  }
}

</mosaic_0001>

<bundles_post_ra>
// kernel: tpu_custom_call.1
= control target key start
LH: loop header
LB: loop body
LE: loop exit
PB: predicated region body
PF: predicated region fallthrough
CT: control target
= control target key end

     0   :  { %vm72_vm0 = vcmask 1040384   ;;  %vm47_vm1 = vcmask 72704   ;;  %vm716_vm2 = vmmov 1   ;;  %vm364_vm4 = vcmask 1045504   ;;  %s876_s1 = inlined_call_operand.vmem [shape: f32[9,8], index: 1, kind: input, shape index: {}]   ;;  %s877_s0 = inlined_call_operand.vmem [shape: f32[64,9], index: 0, kind: input, shape index: {}]   ;;  %s878_s3 = inlined_call_operand.vmem [shape: f32[8,6], index: 3, kind: input, shape index: {}]   ;;  %s879_s5 = inlined_call_operand.vmem [shape: f32[6,3], index: 5, kind: input, shape index: {}]   ;;  %s880_s2 = inlined_call_operand.vmem [shape: f32[1,8], index: 2, kind: input, shape index: {}]   ;;  %s881_s4 = inlined_call_operand.vmem [shape: f32[1,6], index: 4, kind: input, shape index: {}]   ;;  %s882_s6 = inlined_call_operand.vmem [shape: f32[1,3], index: 6, kind: input, shape index: {}]   ;;  %s883_s7 = inlined_call_operand.vmem [shape: f32[64,3], index: 7, kind: output, shape index: {}]  }
   0x1   :  { %v26_v0 = vld [vmem:[%s876_s1] sm:$0xff]  ;;  %v27_v1 = vld [vmem:[%s876_s1 + $0x8] sm:$0x1]  ;;  %vm676_vm3 = vmpackc.low %vm72_vm0, %vm716_vm2  ;;  %vm195_vm5 = vcmask 64512   ;;  %vm339_vm6 = vcmask 48128   ;;  %vm473_vm7 = vcmask 23552  }
   0x2   :  { %v675_v2 = vpack.c.bf16 %v27_v1, %v26_v0  ;;  %v33_v3 = vld [vmem:[%s877_s0] sm:$0xff]  ;;  %v34_v5 = vld [vmem:[%s877_s0 + $0x8] sm:$0xff]  ;;  %v35_v6 = vld [vmem:[%s877_s0 + $0x10] sm:$0xff] }
   0x3   :  { %635 = vmatprep.mubr.msk.f32.mxu0 %vm47_vm1, %v33_v3  ;;  %v29_v4 = vld [vmem:[%s878_s3] sm:$0xff]  ;;  %v36_v7 = vld [vmem:[%s877_s0 + $0x18] sm:$0xff]  ;;  %v38_v9 = vld [vmem:[%s877_s0 + $0x28] sm:$0xff] }
   0x4   :  { %677 = vmatprep.subr.msk.bf16.mxu0 %vm676_vm3, %v675_v2  ;;  %681 = vmatprep.subr.mxu1 %v29_v4  ;;  %v37_v8 = vld [vmem:[%s877_s0 + $0x20] sm:$0xff]  ;;  %v39_v10 = vld [vmem:[%s877_s0 + $0x30] sm:$0xff]  ;;  %v40_v11 = vld [vmem:[%s877_s0 + $0x38] sm:$0xff] }
   0x5   :  { %680 = vmatpush3.bf16.msk.msra.mxu0 %vm676_vm3, %v675_v2  ;;  %682 = vmatpush3.msra.mxu1 %v29_v4  ;;  %v31_v12 = vld [vmem:[%s879_s5] sm:$0x3f] }
   0x6   :  { %647 = vmatprep.subr.mxu0 %v29_v4  ;;  %661 = vmatprep.subr.msk.mxu1 %vm364_vm4, %v31_v12  ;;  %v574_v13 = vld [vmem:[%s880_s2] ss:$0 sm:$0xff] }
   0x7   :  { %v584_v38 = vld [vmem:[%s881_s4] ss:$0 sm:$0xff] }
   0x8   :  { %636 = vmatmul.mubr.msk.f32.vlgmr.msra.gmra.mrb[0].mxu0 %vm47_vm1, %v34_v5  ;;  %v593_v63 = vld [vmem:[%s882_s6] ss:$0 sm:$0xff] }
   0x9   :  { %638 = vmatprep.mubr.msk.f32.mxu0 %vm47_vm1, %v35_v6  ;;  %648 = vmatpush3.msra.mxu0 %v29_v4 }
   0xc   :  { %639 = vmatmul.mubr.msk.f32.gmra.mrb[2].mxu0 %vm47_vm1, %v36_v7 }
   0xd   :  { %641 = vmatprep.mubr.msk.f32.mxu0 %vm47_vm1, %v37_v8 }
  0x10   :  { %642 = vmatmul.mubr.msk.f32.gmra.mrb[4].mxu0 %vm47_vm1, %v38_v9 }
  0x11   :  { %644 = vmatprep.mubr.msk.f32.mxu0 %vm47_vm1, %v39_v10 }
  0x14   :  { %645 = vmatmul.mubr.msk.f32.gmra.mrb[6].mxu0 %vm47_vm1, %v40_v11 }
  0xdb   :  { %v637_v14 = vpop.f32.mrb[0].mxu0 }
  0xdc   :  { %v148_v15 = vadd.f32 %v637_v14, %v574_v13  ;;  %v142_v16 = vpop.f32.mrb[1].mxu0 }
  0xdd   :  { %v143_v17 = vadd.f32 %v574_v13, %v142_v16 }
  0xde   :  { %v182_v20 = vmax.f32 %v148_v15, 0.0 }
  0xdf   :  { %v181_v18 = vmax.f32 %v143_v17, 0.0  ;;  %v640_v19 = vpop.f32.mrb[2].mxu0 }
  0xe0   :  { %v158_v21 = vadd.f32 %v640_v19, %v574_v13  ;;  %v152_v22 = vpop.f32.mrb[3].mxu0 }
  0xe1   :  { %v153_v23 = vadd.f32 %v574_v13, %v152_v22  ;;  %649 = vmatprep.mubr.msk.f32.mxu0 %vm195_vm5, %v181_v18 }
  0xe2   :  { %650 = vmatmul.mubr.msk.f32.vlgmr.msra.gmra.mrb[8].mxu0 %vm195_vm5, %v182_v20  ;;  %v184_v26 = vmax.f32 %v158_v21, 0.0 }
  0xe3   :  { %v183_v24 = vmax.f32 %v153_v23, 0.0  ;;  %v643_v25 = vpop.f32.mrb[4].mxu0 }
  0xe4   :  { %v168_v27 = vadd.f32 %v643_v25, %v574_v13  ;;  %v162_v28 = vpop.f32.mrb[5].mxu0 }
  0xe5   :  { %v163_v29 = vadd.f32 %v574_v13, %v162_v28  ;;  %652 = vmatprep.mubr.msk.f32.mxu1 %vm195_vm5, %v183_v24 }
  0xe6   :  { %v186_v30 = vmax.f32 %v168_v27, 0.0  ;;  %653 = vmatmul.mubr.msk.f32.vlgmr.msra.gmra.mrb[0].mxu1 %vm195_vm5, %v184_v26 }
  0xe7   :  { %v185_v31 = vmax.f32 %v163_v29, 0.0  ;;  %v646_v32 = vpop.f32.mrb[6].mxu0  ;;  %662 = vmatpush3.msk.msra.mxu1 %vm364_vm4, %v31_v12 }
  0xe8   :  { %v178_v33 = vadd.f32 %v646_v32, %v574_v13  ;;  %v172_v34 = vpop.f32.mrb[7].mxu0 }
  0xe9   :  { %v173_v35 = vadd.f32 %v574_v13, %v172_v34  ;;  %655 = vmatprep.mubr.msk.f32.mxu1 %vm195_vm5, %v185_v31 }
  0xea   :  { %v188_v36 = vmax.f32 %v178_v33, 0.0  ;;  %656 = vmatmul.mubr.msk.f32.gmra.mrb[2].mxu1 %vm195_vm5, %v186_v30 }
  0xeb   :  { %v187_v37 = vmax.f32 %v173_v35, 0.0 }
  0xed   :  { %658 = vmatprep.mubr.msk.f32.mxu1 %vm195_vm5, %v187_v37 }
  0xee   :  { %659 = vmatmul.mubr.msk.f32.gmra.mrb[4].mxu1 %vm195_vm5, %v188_v36 }
 0x1b5   :  { %v651_v39 = vpop.f32.mrb[8].mxu0 }
 0x1b6   :  { %v292_v40 = vadd.f32 %v651_v39, %v584_v38  ;;  %v286_v41 = vpop.f32.mrb[9].mxu0 }
 0x1b7   :  { %v287_v42 = vadd.f32 %v584_v38, %v286_v41 }
 0x1b8   :  { %v326_v45 = vmax.f32 %v292_v40, 0.0 }
 0x1b9   :  { %v325_v43 = vmax.f32 %v287_v42, 0.0  ;;  %v654_v44 = vpop.f32.mrb[0].mxu1 }
 0x1ba   :  { %v302_v46 = vadd.f32 %v654_v44, %v584_v38  ;;  %v296_v47 = vpop.f32.mrb[1].mxu1 }
 0x1bb   :  { %v297_v48 = vadd.f32 %v584_v38, %v296_v47  ;;  %663 = vmatprep.mubr.msk.f32.mxu1 %vm339_vm6, %v325_v43 }
 0x1bc   :  { %664 = vmatmul.mubr.msk.f32.vlgmr.msra.gmra.mrb[6].mxu1 %vm339_vm6, %v326_v45  ;;  %v328_v51 = vmax.f32 %v302_v46, 0.0 }
 0x1bd   :  { %v327_v49 = vmax.f32 %v297_v48, 0.0  ;;  %v657_v50 = vpop.f32.mrb[2].mxu1 }
 0x1be   :  { %v312_v52 = vadd.f32 %v657_v50, %v584_v38  ;;  %v306_v53 = vpop.f32.mrb[3].mxu1 }
 0x1bf   :  { %v307_v54 = vadd.f32 %v584_v38, %v306_v53  ;;  %666 = vmatprep.mubr.msk.f32.mxu1 %vm339_vm6, %v327_v49 }
 0x1c0   :  { %v330_v55 = vmax.f32 %v312_v52, 0.0  ;;  %667 = vmatmul.mubr.msk.f32.gmra.mrb[8].mxu1 %vm339_vm6, %v328_v51 }
 0x1c1   :  { %v329_v56 = vmax.f32 %v307_v54, 0.0  ;;  %v660_v57 = vpop.f32.mrb[4].mxu1 }
 0x1c2   :  { %v322_v58 = vadd.f32 %v660_v57, %v584_v38  ;;  %v316_v59 = vpop.f32.mrb[5].mxu1 }
 0x1c3   :  { %v317_v60 = vadd.f32 %v584_v38, %v316_v59  ;;  %669 = vmatprep.mubr.msk.f32.mxu1 %vm339_vm6, %v329_v56 }
 0x1c4   :  { %v332_v61 = vmax.f32 %v322_v58, 0.0  ;;  %670 = vmatmul.mubr.msk.f32.gmra.mrb[10].mxu1 %vm339_vm6, %v330_v55 }
 0x1c5   :  { %v331_v62 = vmax.f32 %v317_v60, 0.0 }
 0x1c7   :  { %672 = vmatprep.mubr.msk.f32.mxu1 %vm339_vm6, %v331_v62 }
 0x1c8   :  { %673 = vmatmul.mubr.msk.f32.gmra.mrb[12].mxu1 %vm339_vm6, %v332_v61 }
 0x28f   :  { %v665_v0 = vpop.f32.mrb[6].mxu1 }
 0x290   :  { %v440_v1 = vadd.f32 %v665_v0, %v593_v63  ;;  %v434_v2 = vpop.f32.mrb[7].mxu1 }
 0x291   :  { %v435_v3 = vadd.f32 %v593_v63, %v434_v2 }
 0x292   :  { %v477_v4 = vsel %vm473_vm7, %v440_v1, -inf }
 0x293   :  { %478 = vmax.xlane.f32.xlu0 %v477_v4  ;;  %v668_v5 = vpop.f32.mrb[8].mxu1  ;;  %v474_v10 = vsel %vm473_vm7, %v435_v3, -inf }
 0x294   :  { %v450_v6 = vadd.f32 %v668_v5, %v593_v63  ;;  %v444_v7 = vpop.f32.mrb[9].mxu1 }
 0x295   :  { %v445_v8 = vadd.f32 %v593_v63, %v444_v7 }
 0x296   :  { %v483_v9 = vsel %vm473_vm7, %v450_v6, -inf }
 0x297   :  { %484 = vmax.xlane.f32.xlu1 %v483_v9  ;;  %v671_v11 = vpop.f32.mrb[10].mxu1  ;;  %475 = vmax.xlane.f32.xlu0 %v474_v10  ;;  %v480_v15 = vsel %vm473_vm7, %v445_v8, -inf }
 0x298   :  { %v454_v12 = vpop.f32.mrb[11].mxu1  ;;  %v460_v14 = vadd.f32 %v671_v11, %v593_v63 }
 0x299   :  { %v455_v13 = vadd.f32 %v593_v63, %v454_v12 }
 0x29a   :  { %v489_v21 = vsel %vm473_vm7, %v460_v14, -inf }
 0x29b   :  { %v674_v16 = vpop.f32.mrb[12].mxu1  ;;  %481 = vmax.xlane.f32.xlu1 %v480_v15  ;;  %v486_v17 = vsel %vm473_vm7, %v455_v13, -inf }
 0x29c   :  { %v464_v18 = vpop.f32.mrb[13].mxu1  ;;  %487 = vmax.xlane.f32.xlu0 %v486_v17  ;;  %v470_v20 = vadd.f32 %v674_v16, %v593_v63 }
 0x29d   :  { %v465_v19 = vadd.f32 %v593_v63, %v464_v18 }
 0x29e   :  { %v495_v23 = vsel %vm473_vm7, %v470_v20, -inf }
 0x29f   :  { %490 = vmax.xlane.f32.xlu1 %v489_v21  ;;  %v492_v22 = vsel %vm473_vm7, %v465_v19, -inf }
 0x2a0   :  { %493 = vmax.xlane.f32.xlu0 %v492_v22 }
 0x2a3   :  { %496 = vmax.xlane.f32.xlu1 %v495_v23 }
 0x320   :  { %v479_v24 = vpop.xlane.xlu0 %478 }
 0x321   :  { %v499_v25 = vsub.f32 %v440_v1, %v479_v24 }
 0x323   :  { %v508_v26 = vmul.f32 1.442695, %v499_v25 }
 0x324   :  { %v485_v27 = vpop.xlane.xlu1 %484  ;;  %v476_v28 = vpop.xlane.xlu0 %475 }
 0x325   :  { %684 = vpow2.f32 %v508_v26  ;;  %v501_v29 = vsub.f32 %v450_v6, %v485_v27  ;;  %v498_v30 = vsub.f32 %v435_v3, %v476_v28 }
 0x327   :  { %v512_v31 = vmul.f32 1.442695, %v501_v29  ;;  %v506_v32 = vmul.f32 1.442695, %v498_v30 }
 0x328   :  { %v482_v33 = vpop.xlane.xlu1 %481 }
 0x329   :  { %686 = vpow2.f32 %v512_v31  ;;  %v500_v34 = vsub.f32 %v445_v8, %v482_v33  ;;  %v488_v35 = vpop.xlane.xlu0 %487 }
 0x32a   :  { %688 = vpow2.f32 %v506_v32  ;;  %v502_v36 = vsub.f32 %v455_v13, %v488_v35 }
 0x32b   :  { %v510_v37 = vmul.f32 1.442695, %v500_v34 }
 0x32c   :  { %v514_v38 = vmul.f32 1.442695, %v502_v36  ;;  %v491_v39 = vpop.xlane.xlu1 %490 }
 0x32d   :  { %690 = vpow2.f32 %v510_v37  ;;  %v503_v40 = vsub.f32 %v460_v14, %v491_v39  ;;  %v494_v41 = vpop.xlane.xlu0 %493 }
 0x32e   :  { %v504_v42 = vsub.f32 %v465_v19, %v494_v41  ;;  %692 = vpow2.f32 %v514_v38 }
 0x32f   :  { %v685_v43 = vpop.eup %684  ;;  %v516_v44 = vmul.f32 1.442695, %v503_v40 }
 0x330   :  { %v518_v45 = vmul.f32 1.442695, %v504_v42  ;;  %v497_v46 = vpop.xlane.xlu1 %496  ;;  %v525_v47 = vsel %vm473_vm7, %v685_v43, 0.0 }
 0x331   :  { %694 = vpow2.f32 %v516_v44  ;;  %v505_v48 = vsub.f32 %v470_v20, %v497_v46  ;;  %526 = vadd.xlane.f32.xlu1 %v525_v47 }
 0x332   :  { %696 = vpow2.f32 %v518_v45 }
 0x333   :  { %v687_v49 = vpop.eup %686  ;;  %v520_v50 = vmul.f32 1.442695, %v505_v48 }
 0x334   :  { %v689_v51 = vpop.eup %688  ;;  %v531_v52 = vsel %vm473_vm7, %v687_v49, 0.0 }
 0x335   :  { %698 = vpow2.f32 %v520_v50  ;;  %532 = vadd.xlane.f32.xlu1 %v531_v52  ;;  %v522_v53 = vsel %vm473_vm7, %v689_v51, 0.0 }
 0x336   :  { %523 = vadd.xlane.f32.xlu0 %v522_v53 }
 0x337   :  { %v691_v54 = vpop.eup %690 }
 0x338   :  { %v528_v55 = vsel %vm473_vm7, %v691_v54, 0.0  ;;  %v693_v56 = vpop.eup %692 }
 0x339   :  { %v534_v59 = vsel %vm473_vm7, %v693_v56, 0.0 }
 0x33a   :  { %529 = vadd.xlane.f32.xlu0 %v528_v55 }
 0x33b   :  { %v695_v57 = vpop.eup %694 }
 0x33c   :  { %v537_v58 = vsel %vm473_vm7, %v695_v57, 0.0  ;;  %v697_v60 = vpop.eup %696 }
 0x33d   :  { %538 = vadd.xlane.f32.xlu1 %v537_v58  ;;  %v540_v63 = vsel %vm473_vm7, %v697_v60, 0.0 }
 0x33e   :  { %535 = vadd.xlane.f32.xlu0 %v534_v59 }
 0x33f   :  { %v699_v61 = vpop.eup %698 }
 0x340   :  { %v543_v62 = vsel %vm473_vm7, %v699_v61, 0.0 }
 0x341   :  { %544 = vadd.xlane.f32.xlu1 %v543_v62 }
 0x342   :  { %541 = vadd.xlane.f32.xlu0 %v540_v63 }
 0x3be   :  { %v527_v0 = vpop.xlane.xlu1 %526 }
 0x3bf   :  { %700 = vrcp.f32 %v527_v0 }
 0x3c2   :  { %v533_v1 = vpop.xlane.xlu1 %532 }
 0x3c3   :  { %702 = vrcp.f32 %v533_v1  ;;  %v524_v2 = vpop.xlane.xlu0 %523 }
 0x3c4   :  { %704 = vrcp.f32 %v524_v2 }
 0x3c7   :  { %v530_v3 = vpop.xlane.xlu0 %529 }
 0x3c8   :  { %706 = vrcp.f32 %v530_v3 }
 0x3c9   :  { %v701_v4 = vpop.eup %700 }
 0x3ca   :  { %v555_v5 = vmul.f32 %v701_v4, %v685_v43  ;;  %v539_v6 = vpop.xlane.xlu1 %538 }
 0x3cb   :  { %708 = vrcp.f32 %v539_v6  ;;  %v536_v7 = vpop.xlane.xlu0 %535 }
 0x3cc   :  { %563 = vst.msk [vmem:[%s883_s7 + $0x8] sm:$0xff] %vm473_vm7, %v555_v5  ;;  %710 = vrcp.f32 %v536_v7 }
 0x3cd   :  { %v703_v8 = vpop.eup %702 }
 0x3ce   :  { %v705_v9 = vpop.eup %704  ;;  %v557_v10 = vmul.f32 %v703_v8, %v687_v49  ;;  %v545_v11 = vpop.xlane.xlu1 %544 }
 0x3cf   :  { %v554_v12 = vmul.f32 %v705_v9, %v689_v51  ;;  %712 = vrcp.f32 %v545_v11  ;;  %v542_v13 = vpop.xlane.xlu0 %541 }
 0x3d0   :  { %565 = vst.msk [vmem:[%s883_s7 + $0x18] sm:$0xff] %vm473_vm7, %v557_v10  ;;  %714 = vrcp.f32 %v542_v13 }
 0x3d1   :  { %562 = vst.msk [vmem:[%s883_s7] sm:$0xff] %vm473_vm7, %v554_v12 }
 0x3d2   :  { %v707_v14 = vpop.eup %706 }
 0x3d3   :  { %v556_v15 = vmul.f32 %v707_v14, %v691_v54 }
 0x3d5   :  { %v709_v16 = vpop.eup %708  ;;  %564 = vst.msk [vmem:[%s883_s7 + $0x10] sm:$0xff] %vm473_vm7, %v556_v15 }
 0x3d6   :  { %v711_v17 = vpop.eup %710  ;;  %v559_v18 = vmul.f32 %v709_v16, %v695_v57 }
 0x3d7   :  { %v558_v19 = vmul.f32 %v711_v17, %v693_v56 }
 0x3d8   :  { %567 = vst.msk [vmem:[%s883_s7 + $0x28] sm:$0xff] %vm473_vm7, %v559_v18 }
 0x3d9   :  { %v713_v20 = vpop.eup %712  ;;  %566 = vst.msk [vmem:[%s883_s7 + $0x20] sm:$0xff] %vm473_vm7, %v558_v19 }
 0x3da   :  { %v715_v21 = vpop.eup %714  ;;  %v561_v22 = vmul.f32 %v713_v20, %v699_v61 }
 0x3db   :  { %v560_v23 = vmul.f32 %v715_v21, %v697_v60 }
 0x3dc   :  { %569 = vst.msk [vmem:[%s883_s7 + $0x38] sm:$0xff] %vm473_vm7, %v561_v22 }
 0x3dd   :  { %568 = vst.msk [vmem:[%s883_s7 + $0x30] sm:$0xff] %vm473_vm7, %v560_v23 }

</bundles_post_ra>
